<compile_context>
chip_gen: v5e
topology: v5e:2x2
jax: 0.10.0
libtpu: 0.0.40
codegen_flags: <defaults>
</compile_context>

<pallas_src>
import functools

import jax
import jax.numpy as jnp
from jax.experimental import pallas as pl
from jax.experimental.pallas import tpu as pltpu


def _fused_kernel(x_ref, w_ref, b_ref, o_ref, xm_scratch, *, input_len, output_len):
    """One (batch, n-tile) step: residual copy-through + trailing-window projection.

    x_ref : (c, n_tile, t)        input tile (batch dim squeezed by BlockSpec)
    w_ref : (K, N)  K = c*L, N = c*P, column j = ch*P + l   (resident in VMEM)
    b_ref : (1, N)  same column order                        (resident in VMEM)
    o_ref : (c, n_tile, t + P)    output tile
    xm_scratch : (n_tile, K) VMEM scratch, columns = cin*L + k
    """
    c, n_tile, t = x_ref.shape
    L = input_len
    P = output_len

    x_tile = x_ref[...]                                   # (c, n_tile, t) - single load

    # 1) residual copy-through: out[..., :t] = x
    o_ref[:, :, :t] = x_tile

    # 2) flatten the trailing window into GEMM layout (n_tile, c*L) using static
    #    lane-sliced stores (explicit; avoids in-kernel transposes / reshapes).
    #    c is small (== d_model here), so the unrolled Python loop stays tiny.
    for ci in range(c):
        xm_scratch[:, ci * L:(ci + 1) * L] = (
            x_tile[ci, :, t - L:].astype(xm_scratch.dtype)
        )

    # 3) single GEMM on the MXU, f32 accumulation, fused bias add.
    acc = jnp.dot(xm_scratch[...], w_ref[...], preferred_element_type=jnp.float32)
    acc = acc + b_ref[...]                                # (n_tile, N) broadcast add

    # 4) scatter per-output-channel column blocks into out[..., t:].
    #    column block [ch*P, (ch+1)*P)  ->  o[ch, :, t:t+P]   (static lane slices)
    for ch in range(c):
        o_ref[ch, :, t:] = acc[:, ch * P:(ch + 1) * P].astype(o_ref.dtype)


def prepare_weights(weight, bias, d_model, input_len, output_len, compute_dtype=None):
    """Hoisted (call-once) conversion of the Conv2d parameters to GEMM layout.

    weight: (c*output_len, c, 1, input_len), PyTorch out-channel index oc = l*c + ch
    bias  : (c*output_len,)
    Returns w_mat (K, N) with columns ordered j = ch*output_len + l, and
    b_row (1, N) f32 in the same column order.
    """
    c, L, P = d_model, input_len, output_len
    K, N = c * L, c * P
    w2 = weight.reshape(N, K)                       # rows oc = l*c+ch, cols cin*L+k
    w3 = w2.reshape(P, c, K).transpose(1, 0, 2)     # reorder rows to (ch, l)
    w_mat = w3.reshape(N, K).T                      # (K, N), col j = ch*P + l
    b_row = bias.reshape(P, c).T.reshape(1, N)      # (1, N), col j = ch*P + l
    if compute_dtype is not None:
        w_mat = w_mat.astype(compute_dtype)         # e.g. bf16 MXU inputs on v6e/v7x
    return jnp.asarray(w_mat), jnp.asarray(b_row).astype(jnp.float32)


def _choose_n_tile(n, c, t, output_len, target_bytes=2 << 20):
    """Largest n-tile that divides n, is a multiple of 8, and keeps the streamed
    x/out blocks around target_bytes (leaves VMEM room for double-buffering)."""
    row_bytes = c * (2 * t + output_len) * 4
    cap = max(8, target_bytes // max(row_bytes, 1))
    cand = min(n, cap)
    cand -= cand % 8
    while cand >= 8:
        if n % cand == 0:
            return cand
        cand -= 8
    return n  # full-extent block is always legal


def residual_extrapolate(x, w_mat, b_row, input_len, output_len, n_tile=None):
    """x: (b, c, n, t); w_mat/b_row from prepare_weights. Returns (b, c, n, t+output_len)."""
    b, c, n, t = x.shape
    L, P = input_len, output_len
    K, N = c * L, c * P
    assert L <= t, (L, t)
    assert w_mat.shape == (K, N), w_mat.shape
    assert b_row.shape == (1, N), b_row.shape

    if n_tile is None:
        n_tile = _choose_n_tile(n, c, t, P)
    n_tiles = n // n_tile

    kernel = functools.partial(_fused_kernel, input_len=L, output_len=P)

    grid_spec = pltpu.PrefetchScalarGridSpec(
        num_scalar_prefetch=0,
        grid=(b, n_tiles),
        in_specs=[
            # x tile: squeeze batch, full c, n-tile, full time
            pl.BlockSpec((None, c, n_tile, t), lambda bi, ni: (bi, 0, ni, 0)),
            # weight / bias: resident across the whole grid (same block index)
            pl.BlockSpec((K, N), lambda bi, ni: (0, 0)),
            pl.BlockSpec((1, N), lambda bi, ni: (0, 0)),
        ],
        out_specs=pl.BlockSpec((None, c, n_tile, t + P), lambda bi, ni: (bi, 0, ni, 0)),
        scratch_shapes=[pltpu.VMEM((n_tile, K), w_mat.dtype)],
    )

    return pl.pallas_call(
        kernel,
        out_shape=jax.ShapeDtypeStruct((b, c, n, t + P), x.dtype),
        grid_spec=grid_spec,
        compiler_params=pltpu.CompilerParams(
            dimension_semantics=("parallel", "parallel")),
    )(x, w_mat, b_row)


if __name__ == "__main__":
    # small shapes consistent with the module
    b, d_model, n, t = 2, 4, 16, 16
    input_len, output_len = 8, 4

    key = jax.random.PRNGKey(0)
    kx, kw, kb = jax.random.split(key, 3)
    x = jax.random.normal(kx, (b, d_model, n, t), dtype=jnp.float32)
    weight = jax.random.normal(
        kw, (d_model * output_len, d_model, 1, input_len), dtype=jnp.float32
    ) * 0.1
    bias = jax.random.normal(kb, (d_model * output_len,), dtype=jnp.float32) * 0.1

    # hoisted, call-once parameter prep (kept out of the per-call path)
    w_mat, b_row = prepare_weights(weight, bias, d_model, input_len, output_len)

    out = residual_extrapolate(x, w_mat, b_row, input_len, output_len)
    out = jax.block_until_ready(out)
    assert out.shape == (b, d_model, n, t + output_len)

    # pure-JAX reference of the same semantics (conv(1,L) == windowed einsum)
    window = x[..., -input_len:]                                    # (b, c, n, L)
    ref_proj = jnp.einsum("bcnl,ocl->bon", window, weight[:, :, 0, :]) + bias[None, :, None]
    ref_proj = ref_proj.reshape(b, output_len, d_model, n).transpose(0, 2, 3, 1)
    ref = jnp.concatenate([x, ref_proj], axis=-1)
    assert jnp.allclose(out, ref, atol=1e-4, rtol=1e-4)

    print("KERNEL_OK")
</pallas_src>

<mosaic_0001>
module attributes {stable_mosaic.version = 11 : i64} {
  func.func @_fused_kernel(%arg0: i32, %arg1: i32, %arg2: memref<1x4x16x16xf32, #tpu.memory_space<vmem>>, %arg3: memref<32x16xf32, #tpu.memory_space<vmem>>, %arg4: memref<1x16xf32, #tpu.memory_space<vmem>>, %arg5: memref<1x4x16x20xf32, #tpu.memory_space<vmem>>, %arg6: memref<16x32xf32, #tpu.memory_space<vmem>>) attributes {dimension_semantics = [#tpu.dimension_semantics<parallel>, #tpu.dimension_semantics<parallel>], iteration_bounds = array<i64: 2, 1>, scalar_prefetch = 0 : i64, scratch_operands = 1 : i64, tpu.core_type = #tpu.core_type<tc>, window_params = [{transform_indices = @transform_0, window_bounds = array<i64: 1, 4, 16, 16>}, {pipeline_mode = #tpu.pipeline_mode<synchronous>, transform_indices = @transform_1, window_bounds = array<i64: 32, 16>}, {pipeline_mode = #tpu.pipeline_mode<synchronous>, transform_indices = @transform_2, window_bounds = array<i64: 1, 16>}, {transform_indices = @transform_3, window_bounds = array<i64: 1, 4, 16, 20>}]} {
    %c0 = arith.constant 0 : index
    %c0_0 = arith.constant 0 : index
    %c0_1 = arith.constant 0 : index
    %c0_2 = arith.constant 0 : index
    %0 = vector.load %arg2[%c0, %c0_0, %c0_1, %c0_2] : memref<1x4x16x16xf32, #tpu.memory_space<vmem>>, vector<1x4x16x16xf32>
    %1 = vector.shape_cast %0 : vector<1x4x16x16xf32> to vector<4x16x16xf32>
    %c0_3 = arith.constant 0 : index
    %c0_4 = arith.constant 0 : index
    %c0_5 = arith.constant 0 : index
    %c0_6 = arith.constant 0 : index
    %2 = vector.load %arg5[%c0_3, %c0_4, %c0_5, %c0_6] : memref<1x4x16x20xf32, #tpu.memory_space<vmem>>, vector<1x4x16x16xf32>
    %3 = vector.shape_cast %2 : vector<1x4x16x16xf32> to vector<4x16x16xf32>
    %4 = vector.shape_cast %1 : vector<4x16x16xf32> to vector<1x4x16x16xf32>
    tpu.vector_store %arg5[%c0_3, %c0_4, %c0_5, %c0_6], %4 {strides = array<i32>} : memref<1x4x16x20xf32, #tpu.memory_space<vmem>>, vector<1x4x16x16xf32>,
    %5 = vector.extract_strided_slice %1 {offsets = [0, 0, 8], sizes = [1, 16, 8], strides = [1, 1, 1]} : vector<4x16x16xf32> to vector<1x16x8xf32>
    %6 = vector.shape_cast %5 : vector<1x16x8xf32> to vector<16x8xf32>
    %c0_7 = arith.constant 0 : index
    %c0_8 = arith.constant 0 : index
    %7 = vector.load %arg6[%c0_7, %c0_8] : memref<16x32xf32, #tpu.memory_space<vmem>>, vector<16x8xf32>
    tpu.vector_store %arg6[%c0_7, %c0_8], %6 {strides = array<i32>} : memref<16x32xf32, #tpu.memory_space<vmem>>, vector<16x8xf32>,
    %8 = vector.extract_strided_slice %1 {offsets = [1, 0, 8], sizes = [1, 16, 8], strides = [1, 1, 1]} : vector<4x16x16xf32> to vector<1x16x8xf32>
    %9 = vector.shape_cast %8 : vector<1x16x8xf32> to vector<16x8xf32>
    %c0_9 = arith.constant 0 : index
    %c8 = arith.constant 8 : index
    %10 = vector.load %arg6[%c0_9, %c8] : memref<16x32xf32, #tpu.memory_space<vmem>>, vector<16x8xf32>
    tpu.vector_store %arg6[%c0_9, %c8], %9 {strides = array<i32>} : memref<16x32xf32, #tpu.memory_space<vmem>>, vector<16x8xf32>,
    %11 = vector.extract_strided_slice %1 {offsets = [2, 0, 8], sizes = [1, 16, 8], strides = [1, 1, 1]} : vector<4x16x16xf32> to vector<1x16x8xf32>
    %12 = vector.shape_cast %11 : vector<1x16x8xf32> to vector<16x8xf32>
    %c0_10 = arith.constant 0 : index
    %c16 = arith.constant 16 : index
    %13 = vector.load %arg6[%c0_10, %c16] : memref<16x32xf32, #tpu.memory_space<vmem>>, vector<16x8xf32>
    tpu.vector_store %arg6[%c0_10, %c16], %12 {strides = array<i32>} : memref<16x32xf32, #tpu.memory_space<vmem>>, vector<16x8xf32>,
    %14 = vector.extract_strided_slice %1 {offsets = [3, 0, 8], sizes = [1, 16, 8], strides = [1, 1, 1]} : vector<4x16x16xf32> to vector<1x16x8xf32>
    %15 = vector.shape_cast %14 : vector<1x16x8xf32> to vector<16x8xf32>
    %c0_11 = arith.constant 0 : index
    %c24 = arith.constant 24 : index
    %16 = vector.load %arg6[%c0_11, %c24] : memref<16x32xf32, #tpu.memory_space<vmem>>, vector<16x8xf32>
    tpu.vector_store %arg6[%c0_11, %c24], %15 {strides = array<i32>} : memref<16x32xf32, #tpu.memory_space<vmem>>, vector<16x8xf32>,
    %c0_12 = arith.constant 0 : index
    %c0_13 = arith.constant 0 : index
    %17 = vector.load %arg6[%c0_12, %c0_13] : memref<16x32xf32, #tpu.memory_space<vmem>>, vector<16x32xf32>
    %c0_14 = arith.constant 0 : index
    %c0_15 = arith.constant 0 : index
    %18 = vector.load %arg3[%c0_14, %c0_15] : memref<32x16xf32, #tpu.memory_space<vmem>>, vector<32x16xf32>
    %cst = arith.constant dense<0.000000e+00> : vector<16x16xf32>
    %19 = tpu.matmul %17, %18, %cst {dimension_numbers = #tpu.dot_dimension_numbers<[1], [0], [0], [1], [0, 0, 1, 1], [], []>} : vector<16x32xf32>, vector<32x16xf32>, vector<16x16xf32> -> vector<16x16xf32>
    %c0_16 = arith.constant 0 : index
    %c0_17 = arith.constant 0 : index
    %20 = vector.load %arg4[%c0_16, %c0_17] : memref<1x16xf32, #tpu.memory_space<vmem>>, vector<1x16xf32>
    %21 = vector.broadcast %20 : vector<1x16xf32> to vector<16x16xf32>
    %22 = arith.addf %19, %21 : vector<16x16xf32>
    %23 = vector.extract_strided_slice %22 {offsets = [0, 0], sizes = [16, 4], strides = [1, 1]} : vector<16x16xf32> to vector<16x4xf32>
    %c0_18 = arith.constant 0 : index
    %c0_19 = arith.constant 0 : index
    %c0_20 = arith.constant 0 : index
    %c16_21 = arith.constant 16 : index
    %24 = vector.load %arg5[%c0_18, %c0_19, %c0_20, %c16_21] : memref<1x4x16x20xf32, #tpu.memory_space<vmem>>, vector<1x1x16x4xf32>
    %25 = vector.shape_cast %24 : vector<1x1x16x4xf32> to vector<16x4xf32>
    %26 = vector.shape_cast %23 : vector<16x4xf32> to vector<1x1x16x4xf32>
    tpu.vector_store %arg5[%c0_18, %c0_19, %c0_20, %c16_21], %26 {strides = array<i32>} : memref<1x4x16x20xf32, #tpu.memory_space<vmem>>, vector<1x1x16x4xf32>,
    %27 = vector.extract_strided_slice %22 {offsets = [0, 4], sizes = [16, 4], strides = [1, 1]} : vector<16x16xf32> to vector<16x4xf32>
    %c0_22 = arith.constant 0 : index
    %c1 = arith.constant 1 : index
    %c0_23 = arith.constant 0 : index
    %c16_24 = arith.constant 16 : index
    %28 = vector.load %arg5[%c0_22, %c1, %c0_23, %c16_24] : memref<1x4x16x20xf32, #tpu.memory_space<vmem>>, vector<1x1x16x4xf32>
    %29 = vector.shape_cast %28 : vector<1x1x16x4xf32> to vector<16x4xf32>
    %30 = vector.shape_cast %27 : vector<16x4xf32> to vector<1x1x16x4xf32>
    tpu.vector_store %arg5[%c0_22, %c1, %c0_23, %c16_24], %30 {strides = array<i32>} : memref<1x4x16x20xf32, #tpu.memory_space<vmem>>, vector<1x1x16x4xf32>,
    %31 = vector.extract_strided_slice %22 {offsets = [0, 8], sizes = [16, 4], strides = [1, 1]} : vector<16x16xf32> to vector<16x4xf32>
    %c0_25 = arith.constant 0 : index
    %c2 = arith.constant 2 : index
    %c0_26 = arith.constant 0 : index
    %c16_27 = arith.constant 16 : index
    %32 = vector.load %arg5[%c0_25, %c2, %c0_26, %c16_27] : memref<1x4x16x20xf32, #tpu.memory_space<vmem>>, vector<1x1x16x4xf32>
    %33 = vector.shape_cast %32 : vector<1x1x16x4xf32> to vector<16x4xf32>
    %34 = vector.shape_cast %31 : vector<16x4xf32> to vector<1x1x16x4xf32>
    tpu.vector_store %arg5[%c0_25, %c2, %c0_26, %c16_27], %34 {strides = array<i32>} : memref<1x4x16x20xf32, #tpu.memory_space<vmem>>, vector<1x1x16x4xf32>,
    %35 = vector.extract_strided_slice %22 {offsets = [0, 12], sizes = [16, 4], strides = [1, 1]} : vector<16x16xf32> to vector<16x4xf32>
    %c0_28 = arith.constant 0 : index
    %c3 = arith.constant 3 : index
    %c0_29 = arith.constant 0 : index
    %c16_30 = arith.constant 16 : index
    %36 = vector.load %arg5[%c0_28, %c3, %c0_29, %c16_30] : memref<1x4x16x20xf32, #tpu.memory_space<vmem>>, vector<1x1x16x4xf32>
    %37 = vector.shape_cast %36 : vector<1x1x16x4xf32> to vector<16x4xf32>
    %38 = vector.shape_cast %35 : vector<16x4xf32> to vector<1x1x16x4xf32>
    tpu.vector_store %arg5[%c0_28, %c3, %c0_29, %c16_30], %38 {strides = array<i32>} : memref<1x4x16x20xf32, #tpu.memory_space<vmem>>, vector<1x1x16x4xf32>,
    return
  }
  func.func @transform_0(%arg0: i32, %arg1: i32) -> (i32, i32, i32, i32) {
    %c0_i32 = arith.constant 0 : i32
    %c0_i32_0 = arith.constant 0 : i32
    %c0_i32_1 = arith.constant 0 : i32
    return %arg0, %c0_i32, %arg1, %c0_i32_0 : i32, i32, i32, i32
  }
  func.func @transform_1(%arg0: i32, %arg1: i32) -> (i32, i32) {
    %c0_i32 = arith.constant 0 : i32
    %c0_i32_0 = arith.constant 0 : i32
    %c0_i32_1 = arith.constant 0 : i32
    return %c0_i32, %c0_i32_0 : i32, i32
  }
  func.func @transform_2(%arg0: i32, %arg1: i32) -> (i32, i32) {
    %c0_i32 = arith.constant 0 : i32
    %c0_i32_0 = arith.constant 0 : i32
    %c0_i32_1 = arith.constant 0 : i32
    return %c0_i32, %c0_i32_0 : i32, i32
  }
  func.func @transform_3(%arg0: i32, %arg1: i32) -> (i32, i32, i32, i32) {
    %c0_i32 = arith.constant 0 : i32
    %c0_i32_0 = arith.constant 0 : i32
    %c0_i32_1 = arith.constant 0 : i32
    return %arg0, %c0_i32, %arg1, %c0_i32_0 : i32, i32, i32, i32
  }
}

</mosaic_0001>

<bundles_post_ra>
// kernel: tpu_custom_call.1
= control target key start
LH: loop header
LB: loop body
LE: loop exit
PB: predicated region body
PF: predicated region fallthrough
CT: control target
= control target key end

     0   :  { %8 = vsyncpa [#allocation4], 0  ;;  %s878_s0 = inlined_call_operand.hbm [shape: f32[2,4,16,16], index: 0, kind: input, shape index: {}]   ;;  %s879_s1 = inlined_call_operand.vmem [shape: f32[32,16], index: 1, kind: input, shape index: {}]   ;;  %s880_s2 = inlined_call_operand.vmem [shape: f32[1,16], index: 2, kind: input, shape index: {}]   ;;  %s881_s3 = inlined_call_operand.hbm [shape: f32[2,4,16,20], index: 3, kind: output, shape index: {}]  }
   0x1   :  { %10 = vsyncpa [#allocation4 + $0x1], 0 }
   0x2   :  { %11 = vsyncpa [#allocation5], 0 }
   0x3   :  { %13 = vsyncpa [#allocation5 + $0x1], 0  ;;  %s689_s12 = smov 0   ;;  %s691_s13 = smov 0  }
   0x4   :  { %s693_s14 = smov 0   ;;  %s695_s15 = smov 0  }
   0x5   :  { %s697_s16 = smov 0   ;;  %s699_s17 = smov 0  }
   0x6 LB: > { %s447_s18 = sadd.s32 4294967295, %s659_s17   ;;  %s448_s19 = sadd.s32 4294967294, %s659_s17   ;;  %s659_s17 = sphi %s699_s17, %s19_s17   ;;  %s655_s16 = sphi %s697_s16, %s890_s16   ;;  %s651_s15 = sphi %s695_s15, %s889_s15   ;;  %s647_s14 = sphi %s693_s14, %s888_s14   ;;  %s643_s13 = sphi %s691_s13, %s887_s13   ;;  %s639_s12 = sphi %s689_s12, %s886_s12  }
   0x7   : > { %s31_s20 = sadd.s32 1, %s655_s16  ;;  %s40_s21 = sadd.s32 1, %s647_s14 }
   0x8   : > { %p33_p0 = scmp.ge.s32.totalorder %s31_s20, 2  ;;  %p47_p1 = scmp.ne.s32.totalorder %s647_s14, %s643_s13 }
   0x9   : > { %p48_p2 = scmp.eq.s32.totalorder %s659_s17, 0  ;;  %p53_p3 = scmp.ne.s32.totalorder %s643_s13, %s639_s12 }
   0xa   : > { %s892_s20 = smov (%p33_p0, %s31_s20), 0  ;;  %p54_p5 = scmp.eq.s32.totalorder %s447_s18, 0 }
   0xb   : > { %p730_p4 = por %p48_p2, %p47_p1  ;;  %s35_s23 = ssub.s32 %s655_s16, %s892_s20 }
   0xc   : > { %p121_p6 = scmp.eq.s32.totalorder %s447_s18, 1  ;;  %p38_p7 = scmp.eq.s32.totalorder %s35_s23, 0 }
   0xd   : > { %p736_p8 = por %p54_p5, %p53_p3  ;;  %p127_p10 = scmp.eq.s32.totalorder %s448_s19, 1 }
   0xe   : > { %p740_p9 = por %p121_p6, %p47_p1  ;;  %p450_p12 = scmp.ge.s32.totalorder %s659_s17, 2 }
   0xf   : > { %s745_s26 = scalar_select %p38_p7, %s647_s14, %s40_s21  }
  0x10   : > { %p747_p11 = por %p127_p10, %p53_p3  ;;  %p488_p13 = scmp.lt.s32.totalorder %s659_s17, 2 }
  0x11   : > { %s153_s28 = sand.u32 1, %s647_s14   ;;  %s470_s30 = sshll.u32 %s655_s16, 6 }
  0x12   : > { %s451_s29 = sshll.u32 %s153_s28, 6  ;;  %s164_s6 = scalar_lea.hbm %s878_s0, %s470_s30 }
  0x13   : > { %s157_s7 = scalar_lea.vmem [#allocation3], %s451_s29  ;;  %s165_s9 = sshll.u32 %s164_s6, 4  ;;  %s166_s9 = int_to_ptr.hbm [resolvable:$true] %s165_s9 }
  0x14   : > { %s167_s8 = sshll.u32 %s157_s7, 4  ;;  %p481_p0 = pnand %p488_p13, %p730_p4  ;;  %s168_s8 = int_to_ptr.vmem [resolvable:$true] %s167_s8 }
  0x15   : > { %p454_p1 = scmp.ge.s32.totalorder %s659_s17, 1  ;;  %s154_s10 = scalar_lea.sflag [#allocation4], %s153_s28 }
  0x16   : > { %s661_s11 = smov 128   ;;  %s662_s18 = smov 8  }
  0x17   : > { %483 = dma.hbm_to_vmem [thread:$0]  (!%p481_p0), %s166_s9, 1024, %s168_s8, %s154_s10, %s661_s11, %s661_s11, %s662_s18  }
  0x18   : > { %p175_p2 = scmp.lt.s32.totalorder %s659_s17, 3 }
  0x1a   : > { %p176_p3 = pnand %p454_p1, %p175_p2 }
  0x1b   : > { %s763_s19 = sand.u32 (!%p176_p3), 1, %s643_s13  }
  0x1c   : > { %179 = sbr.rel (%p176_p3) target bundleno = 433 (0x1b1), region = 32  ;;  %s455_s21 = sshll.u32 (!%p176_p3), %s763_s19, 6 }
  0x1d   : > { %s182_s23 = scalar_lea.sflag (!%p176_p3), [#allocation4], %s763_s19  ;;  %s767_s29 = scalar_lea.vmem (!%p176_p3), [#allocation3], %s455_s21 }
  0x21   : > { %630 = dma.done.wait (%p736_p8), %s182_s23, 1024  }
  0x22   : > { %632 = vsyncadd (%p736_p8), %s182_s23, 4294966272  ;;  %v211_v0 = vld [vmem:[%s767_s29] sm:$0xff]  ;;  %vm219_vm0 = vcmask 130048   ;;  %s663_s22 = smov 120   ;;  %s775_s28 = scalar_lea.vmem [#allocation6], %s455_s21  ;;  %v212_v2 = vld [vmem:[%s767_s29 + $0x8] sm:$0xff] }
  0x23   : > { %v215_v1 = vld [vmem:[%s767_s29 + $0x20] sm:$0xff]  ;;  %230 = vrot.lane.b32.xlu0 %v211_v0, %s663_s22  ;;  %220 = vst.msk [vmem:[%s775_s28] sm:$0xff] %vm219_vm0, %v211_v0  ;;  %s664_s24 = smov 8   ;;  %v217_v3 = vld [vmem:[%s767_s29 + $0x30] sm:$0xff]  ;;  %s665_s30 = smov 16   ;;  %vm236_vm1 = vcmask 64512  }
  0x24   : > { %244 = vrot.lane.b32.xlu1 %v215_v1, %s664_s24  ;;  %224 = vst.msk [vmem:[%s775_s28 + $0x20] sm:$0xff] %vm219_vm0, %v215_v1  ;;  %v216_v4 = vld [vmem:[%s767_s29 + $0x28] sm:$0xff]  ;;  %255 = vrot.lane.b32.xlu2 %v217_v3, %s665_s30  ;;  %vm239_vm2 = vcmask 130112   ;;  %vm250_vm3 = vcmask 195712   ;;  %vm261_vm4 = vcmask 261312   ;;  %vm274_vm5 = vcmask 261120  }
  0x25   : > { %221 = vst.msk [vmem:[%s775_s28 + $0x8] sm:$0xff] %vm219_vm0, %v212_v2  ;;  %v218_v5 = vld [vmem:[%s767_s29 + $0x38] sm:$0xff]  ;;  %v213_v6 = vld [vmem:[%s767_s29 + $0x10] sm:$0xff]  ;;  %v269_v7 = vld [vmem:[%s879_s1 + $0x18] sm:$0xff]  ;;  %s666_s23 = smov 12   ;;  %vm312_vm6 = vcmask 162944  }
  0x26   : > { %225 = vst.msk [vmem:[%s775_s28 + $0x28] sm:$0xff] %vm219_vm0, %v216_v4  ;;  %v268_v8 = vld [vmem:[%s879_s1 + $0x10] sm:$0xff]  ;;  %v214_v9 = vld [vmem:[%s767_s29 + $0x18] sm:$0xff]  ;;  %293 = vmatpush.msra.mxu0 %v269_v7  ;;  %472 = vmatpush.msra.mxu1 %v269_v7  ;;  %v266_v11 = vld [vmem:[%s879_s1] sm:$0xff]  ;;  %s667_s29 = smov 4   ;;  %s357_s6 = sshll.u32 %s775_s28, 4  ;;  %s358_s6 = int_to_ptr.vmem [resolvable:$true] %s357_s6 }
  0x27   : > { %226 = vst.msk [vmem:[%s775_s28 + $0x30] sm:$0xff] %vm219_vm0, %v217_v3  ;;  %v267_v10 = vld [vmem:[%s879_s1 + $0x8] sm:$0xff]  ;;  %v546_v20 = vld [vmem:[%s880_s2] ss:$0 sm:$0xff]  ;;  %s343_s8 = scalar_lea.sflag [#allocation5], %s763_s19  ;;  %s597_s18 = scalar_lea.hbm %s881_s3, 128 }
  0x28   : > { %227 = vst.msk [vmem:[%s775_s28 + $0x38] sm:$0xff] %vm219_vm0, %v218_v5  ;;  %294 = vmatpush.msra.mxu0 %v268_v8  ;;  %473 = vmatpush.msra.mxu1 %v268_v8 }
  0x29   : > { %222 = vst.msk [vmem:[%s775_s28 + $0x10] sm:$0xff] %vm219_vm0, %v213_v6 }
  0x2a   : > { %223 = vst.msk [vmem:[%s775_s28 + $0x18] sm:$0xff] %vm219_vm0, %v214_v9  ;;  %295 = vmatpush.msra.mxu0 %v267_v10  ;;  %474 = vmatpush.msra.mxu1 %v267_v10 }
  0x2b   : > { %232 = vrot.lane.b32.xlu0 %v212_v2, %s663_s22  ;;  %s471_s22 = sshll.u32 %s651_s15, 6 }
  0x2c   : > { %246 = vrot.lane.b32.xlu1 %v216_v4, %s664_s24  ;;  %257 = vrot.lane.b32.xlu2 %v218_v5, %s665_s30  ;;  %s356_s5 = scalar_lea.hbm %s881_s3, %s471_s22 }
  0x2d   : > { %296 = vmatpush.msra.mxu0 %v266_v11  ;;  %475 = vmatpush.msra.mxu1 %v266_v11  ;;  %s359_s7 = sshll.u32 %s356_s5, 4  ;;  %s360_s7 = int_to_ptr.hbm [resolvable:$true] %s359_s7 }
  0x2e   : > { %s591_s15 = sshra.s32 %s360_s7, 4  ;;  %s592_s15 = int_to_ptr.hbm [resolvable:$true] %s591_s15 }
  0x2f   : > { %s593_s9 = scalar_lea.hbm %s592_s15, 64  ;;  %p598_p7 = scmp.lt.s32.totalorder %s592_s15, %s881_s3 }
  0x30   : > { %p594_p4 = scmp.ne.s32.totalorder %s592_s15, %s593_s9  ;;  %p599_p8 = scmp.lt.s32.totalorder %s597_s18, %s593_s9 }
  0x32   : > { %p595_p5 = pnand %p594_p4, %p740_p9  ;;  %p600_p10 = por %p599_p8, %p598_p7 }
  0x34   : > { %p596_p6 = pneg %p595_p5 }
  0x36   : > { %p601_p13 = pnand %p600_p10, %p596_p6 }
  0x7e   : > { %v256_v12 = vpop.permute.xlu2 %255 }
  0x86   : > { %v258_v17 = vpop.permute.xlu2 %257 }
  0x95   : > { %v231_v13 = vpop.permute.xlu0 %230 }
  0x96   : > { %v245_v14 = vpop.permute.xlu1 %244  ;;  %237 = vst.msk [vmem:[#allocation2] sm:$0xff] %vm236_vm1, %v231_v13 }
  0x97   : > { %240 = vst.msk [vmem:[#allocation2] sm:$0xff] %vm239_vm2, %v213_v6 }
  0x98   : > { %251 = vst.msk [vmem:[#allocation2] sm:$0xff] %vm250_vm3, %v245_v14 }
  0x99   : > { %262 = vst.msk [vmem:[#allocation2] sm:$0xff] %vm261_vm4, %v256_v12 }
  0x9d   : > { %v233_v15 = vpop.permute.xlu0 %232 }
  0x9e   : > { %v247_v16 = vpop.permute.xlu1 %246  ;;  %238 = vst.msk [vmem:[#allocation2 + $0x8] sm:$0xff] %vm236_vm1, %v233_v15 }
  0x9f   : > { %241 = vst.msk [vmem:[#allocation2 + $0x8] sm:$0xff] %vm239_vm2, %v214_v9 }
  0xa0   : > { %252 = vst.msk [vmem:[#allocation2 + $0x8] sm:$0xff] %vm250_vm3, %v247_v16  ;;  %v264_v18 = vld [vmem:[#allocation2] sm:$0xff] }
  0xa1   : > { %263 = vst.msk [vmem:[#allocation2 + $0x8] sm:$0xff] %vm261_vm4, %v258_v17  ;;  %457 = vmatmul.msk.f32.vlgmr.msra.gmra.mxu0 %vm274_vm5, %v264_v18 }
  0xa8   : > { %v265_v19 = vld [vmem:[#allocation2 + $0x8] sm:$0xff] }
  0xa9   : > { %458 = vmatmul.msk.f32.vlgmr.msra.gmra.mxu1 %vm274_vm5, %v265_v19 }
 0x11e   : > { %v298_v21 = vpop.f32.mrf.mxu0 }
 0x11f   : > { %v299_v22 = vadd.f32 %v546_v20, %v298_v21 }
 0x121   : > { %315 = vrot.lane.b32.xlu2 %v299_v22, %s666_s23  ;;  %306 = vrot.lane.b32.xlu0 %v299_v22, %s665_s30 }
 0x126   : > { %v301_v23 = vpop.f32.mrf.mxu1 }
 0x127   : > { %v302_v24 = vadd.f32 %v546_v20, %v301_v23 }
 0x129   : > { %326 = vrot.lane.b32.xlu2 %v302_v24, %s664_s24  ;;  %317 = vrot.lane.b32.xlu0 %v302_v24, %s666_s23 }
 0x12a   : > { %308 = vrot.lane.b32.xlu1 %v302_v24, %s665_s30 }
 0x131   : > { %333 = vrot.lane.b32.xlu0 %v299_v22, %s667_s29 }
 0x132   : > { %324 = vrot.lane.b32.xlu1 %v299_v22, %s664_s24 }
 0x13a   : > { %335 = vrot.lane.b32.xlu1 %v302_v24, %s667_s29 }
 0x17b   : > { %v316_v25 = vpop.permute.xlu2 %315 }
 0x17c   : > { %459 = vst.msk [vmem:[%s775_s28 + $0x10] sm:$0xff] %vm312_vm6, %v316_v25 }
 0x183   : > { %v327_v26 = vpop.permute.xlu2 %326 }
 0x184   : > { %462 = vst.msk [vmem:[%s775_s28 + $0x28] sm:$0xff] %vm312_vm6, %v327_v26 }
 0x193   : > { %v307_v27 = vpop.permute.xlu0 %306 }
 0x194   : > { %313 = vst.msk [vmem:[%s775_s28] sm:$0xff] %vm312_vm6, %v307_v27 }
 0x19b   : > { %v318_v28 = vpop.permute.xlu0 %317 }
 0x19c   : > { %v309_v29 = vpop.permute.xlu1 %308  ;;  %460 = vst.msk [vmem:[%s775_s28 + $0x18] sm:$0xff] %vm312_vm6, %v318_v28 }
 0x19d   : > { %314 = vst.msk [vmem:[%s775_s28 + $0x8] sm:$0xff] %vm312_vm6, %v309_v29 }
 0x1a3   : > { %v334_v30 = vpop.permute.xlu0 %333 }
 0x1a4   : > { %v325_v31 = vpop.permute.xlu1 %324  ;;  %463 = vst.msk [vmem:[%s775_s28 + $0x30] sm:$0xff] %vm312_vm6, %v334_v30 }
 0x1a5   : > { %461 = vst.msk [vmem:[%s775_s28 + $0x20] sm:$0xff] %vm312_vm6, %v325_v31 }
 0x1ac   : > { %v336_v32 = vpop.permute.xlu1 %335 }
 0x1ad   : > { %464 = vst.msk [vmem:[%s775_s28 + $0x38] sm:$0xff] %vm312_vm6, %v336_v32 }
 0x1ae   : > { %604 = shalt.err (!%p601_p13)
}
 0x1af   : > { %s668_s19 = smov 128  }
 0x1b0   : > { %478 = dma.vmem_to_hbm [thread:$0]  (%p740_p9), %s358_s6, 1024, %s360_s7, %s343_s8, %s668_s19, %s668_s19, %s664_s24  }
 0x1b1 PF: > { %s374_s28 = sand.u32 1, %s639_s12   ;;  %p485_p0 = pnand %p450_p12, %p747_p11 }
 0x1b2   : > { %s375_s29 = scalar_lea.sflag [#allocation5], %s374_s28 }
 0x1b3   : > { %p486_p1 = pneg %p485_p0 }
 0x1b5   : > { %634 = dma.done.wait (%p486_p1), %s375_s29, 1024  }
 0x1b6   : > { %636 = vsyncadd (%p486_p1), %s375_s29, 4294966272  ;;  %s19_s17 = sadd.s32 1, %s659_s17   ;;  %s886_s12 = smov %s643_s13 }
 0x1b7   : > { %p16_p2 = scmp.ge.s32.totalorder %s19_s17, 4   ;;  %s887_s13 = smov %s647_s14 }
 0x1b8   : > { %s888_s14 = smov %s745_s26  ;;  %s889_s15 = smov %s655_s16 }
 0x1b9   : > { %s890_s16 = smov %s892_s20  ;;  %18 = sbr.rel (!%p16_p2) target bundleno = 6 (0x6), region = 80 }
 0x1be   :  { %381 = vsyncpa [#allocation4], 1 }
 0x1bf   :  { %383 = vsyncpa [#allocation4 + $0x1], 1 }
 0x1c0   :  { %384 = vsyncpa [#allocation5], 1 }
 0x1c1   :  { %386 = vsyncpa [#allocation5 + $0x1], 1 }

</bundles_post_ra>
